<compile_context>
chip_gen: v6e
topology: v6e:2x2x1
jax: 0.10.0
libtpu: 0.0.40
codegen_flags: <defaults>
</compile_context>

<pallas_src>
import jax
import jax.numpy as jnp
from jax.experimental import pallas as pl
from jax.experimental.pallas import tpu as pltpu


# ----------------------------------------------------------------------------
# Materialized path: single HBM -> HBM DMA of the whole observation batch.
# ----------------------------------------------------------------------------
def _dma_identity_kernel(obs_hbm, out_hbm, sem):
    # One whole-array DMA: read obs once from HBM, write the output once.
    cp = pltpu.make_async_copy(obs_hbm, out_hbm, sem)
    cp.start()
    cp.wait()


def _identity_dma_copy(obs: jax.Array) -> jax.Array:
    nbytes = obs.size * jnp.dtype(obs.dtype).itemsize
    return pl.pallas_call(
        _dma_identity_kernel,
        out_shape=jax.ShapeDtypeStruct(obs.shape, obs.dtype),
        in_specs=[pl.BlockSpec(memory_space=pl.ANY)],   # stay in HBM, no auto-DMA
        out_specs=pl.BlockSpec(memory_space=pl.ANY),
        scratch_shapes=[pltpu.SemaphoreType.DMA(())],
        cost_estimate=pl.CostEstimate(
            flops=0, transcendentals=0, bytes_accessed=2 * nbytes
        ),
    )(obs)


# ----------------------------------------------------------------------------
# Public wrapper: IdentityObsEncoder.forward
# ----------------------------------------------------------------------------
def identity_obs_encoder(obs: jax.Array, *, materialize_copy: bool = True) -> jax.Array:
    """Pallas implementation of IdentityObsEncoder.forward (returns obs unchanged).

    materialize_copy=True (default): produce a distinct output buffer via a
        single HBM->HBM DMA (one read + one write of the payload, no grid).
    materialize_copy=False: zero-cost identity — just return obs (no kernel),
        matching the PyTorch module exactly with no launch overhead.
    """
    if materialize_copy:
        return _identity_dma_copy(obs)
    return obs


# TODO(synk): EnvManager/GymEnvManager host-side env stepping has no Pallas
# equivalent (gym calls on CPU); only the encoder forward is implemented.


if __name__ == "__main__":
    key = jax.random.PRNGKey(0)

    # 2 environments, CartPole-style 4-dim observation.
    obs = jax.random.normal(key, (2, 4), dtype=jnp.float32)

    # Materialized single-DMA copy (default path).
    out_copy = jax.block_until_ready(identity_obs_encoder(obs))
    assert out_copy.shape == obs.shape and out_copy.dtype == obs.dtype
    assert bool(jnp.all(out_copy == obs))

    # Zero-cost alias path (no kernel, exact identity).
    out_alias = jax.block_until_ready(identity_obs_encoder(obs, materialize_copy=False))
    assert out_alias.shape == obs.shape and out_alias.dtype == obs.dtype
    assert bool(jnp.all(out_alias == obs))

    # A non-aligned batch shape: the DMA path needs no padding or repacking.
    obs2 = jax.random.normal(jax.random.PRNGKey(1), (33, 4), dtype=jnp.float32)
    out2 = jax.block_until_ready(identity_obs_encoder(obs2))
    assert out2.shape == obs2.shape and bool(jnp.all(out2 == obs2))

    # A non-f32 dtype: DMA path is dtype-independent (no sublane rounding).
    obs3 = jax.random.normal(jax.random.PRNGKey(2), (8, 6), dtype=jnp.bfloat16)
    out3 = jax.block_until_ready(identity_obs_encoder(obs3))
    assert out3.dtype == jnp.bfloat16 and bool(jnp.all(out3 == obs3))

    print("KERNEL_OK")
</pallas_src>

<mosaic_0001>
module attributes {stable_mosaic.version = 11 : i64} {
  func.func @_dma_identity_kernel(%arg0: memref<2x4xf32, #tpu.memory_space<any>>, %arg1: memref<2x4xf32, #tpu.memory_space<any>>, %arg2: memref<!tpu.dma_semaphore, #tpu.memory_space<semaphore_mem>>) attributes {dimension_semantics = [], scalar_prefetch = 0 : i64, scratch_operands = 1 : i64, tpu.core_type = #tpu.core_type<tc>} {
    tpu.enqueue_dma source(%arg0 : memref<2x4xf32, #tpu.memory_space<any>>) target(%arg1 : memref<2x4xf32, #tpu.memory_space<any>>) target_semaphore(%arg2 : memref<!tpu.dma_semaphore, #tpu.memory_space<semaphore_mem>>)
    tpu.wait_dma2 semaphore(%arg2 : memref<!tpu.dma_semaphore, #tpu.memory_space<semaphore_mem>>) src(%arg0 : memref<2x4xf32, #tpu.memory_space<any>>) dst(%arg1 : memref<2x4xf32, #tpu.memory_space<any>>)
    return
  }
}

</mosaic_0001>

<bundles_post_ra>
// kernel: tpu_custom_call.1
= control target key start
LH: loop header
LB: loop body
LE: loop exit
PB: predicated region body
PF: predicated region fallthrough
CT: control target
= control target key end

     0   :  { %s28_s6 = smov [#allocation2]   ;;  %s29_s7 = smov 131072   ;;  %s47_s0 = inlined_call_operand.hbm [shape: f32[2,4], index: 0, kind: input, shape index: {}]   ;;  %s48_s1 = inlined_call_operand.hbm [shape: f32[2,4], index: 1, kind: output, shape index: {}]  }
   0x1   :  { %s30_s8 = smov 0  }
   0x2   :  { %12 = dma.general %s47_s0, 32, %s48_s1, %s28_s6, %s29_s7, [#allocation4], %s30_s8, 0  }
   0x3   :  { %26 = dma.done.wait [#allocation2], 32 }
   0x4   :  { %27 = vsyncadd [#allocation2], 4294967264 }
   0x5   :  { %16 = vsyncmov [#allocation2] }
   0x8   :  { %s17_s13 = vpop.sfrf %16 }
   0x9   :  { %p22_p0 = scmp.ne.s32.totalorder %s17_s13, 0 }
   0xb   :  { %21 = shalt.err (%p22_p0)  }

</bundles_post_ra>
